<compile_context>
chip_gen: v7x
topology: tpu7x:2x2x1
jax: 0.10.0
libtpu: 0.0.40
codegen_flags: <defaults>
</compile_context>

<pallas_src>
import jax
import jax.numpy as jnp
from jax.experimental import pallas as pl
from jax.experimental.pallas import tpu as pltpu


def _round_up(a: int, b: int) -> int:
    return (a + b - 1) // b * b


def _mlp_kernel(x_ref, w1_ref, b1_ref, w2_ref, b2_ref, o_ref):
    # fc1 on the MXU: cast the x tile to the weight dtype (bf16) in-register,
    # accumulate in f32.
    xb = x_ref[...].astype(w1_ref.dtype)
    h = jnp.dot(xb, w1_ref[...], preferred_element_type=jnp.float32)
    # Bias add + ReLU in f32 on the VPU (v5e has no bf16 VPU path).
    h = jnp.maximum(h + b1_ref[...], 0.0)
    # fc2 on the MXU (bf16 operands, f32 accumulation).
    y = jnp.dot(h.astype(w2_ref.dtype), w2_ref[...],
                preferred_element_type=jnp.float32)
    o_ref[...] = (y + b2_ref[...]).astype(o_ref.dtype)


def prepare_params(w1, b1, w2, b2, *, compute_dtype=jnp.bfloat16):
    """Pad/cast the Linear parameters ONCE (hoisted out of the forward pass).

    w1: (F, H), b1: (1, H) or (H,), w2: (H, H), b2: (1, H) or (H,).
    The hidden dim is zero-padded to a multiple of 128 (lane-dense MXU tiles);
    zero padding is exact for this network: padded hidden units are relu(0)=0
    and padded W2 rows/columns are 0, so padded output columns are 0 and get
    sliced away.
    """
    F, H = w1.shape
    Hp = _round_up(H, 128)
    w1p = jnp.zeros((F, Hp), compute_dtype).at[:, :H].set(w1.astype(compute_dtype))
    w2p = jnp.zeros((Hp, Hp), compute_dtype).at[:H, :H].set(w2.astype(compute_dtype))
    b1p = jnp.zeros((1, Hp), jnp.float32).at[:, :H].set(
        jnp.reshape(b1, (1, H)).astype(jnp.float32))
    b2p = jnp.zeros((1, Hp), jnp.float32).at[:, :H].set(
        jnp.reshape(b2, (1, H)).astype(jnp.float32))
    return {"w1": w1p, "b1": b1p, "w2": w2p, "b2": b2p, "F": F, "H": H, "Hp": Hp}


def _choose_batch_tile(N: int, tile_n: int) -> int:
    if N <= 16:
        return N                      # single exact tile, no padding / masking
    # Ensure >= 2 grid steps so v7x's two TensorCores both get work; 16-row
    # alignment keeps bf16 vregs fully packed inside the kernel.
    tn = min(int(tile_n), _round_up(pl.cdiv(N, 2), 16))
    return max(16, _round_up(tn, 16))


def prototypical_network_forward(x, params, *, tile_n=512, out_dtype=None,
                                 allow_xla_fast_path=False):
    """x: (N, F). Returns fc2(relu(fc1(x))) with shape (N, H)."""
    N, F = x.shape
    H, Hp = params["H"], params["Hp"]
    assert F == params["F"], "feature_dim mismatch with prepared params"
    out_dtype = jnp.dtype(x.dtype if out_dtype is None else out_dtype)
    w1p, b1p, w2p, b2p = params["w1"], params["b1"], params["w2"], params["b2"]

    # Optional tiny-problem fast path (a pallas_call launch costs a few us).
    if allow_xla_fast_path and (2 * N * (F + Hp) * Hp) < (1 << 22):
        h = jnp.maximum(jnp.dot(x.astype(w1p.dtype), w1p,
                                preferred_element_type=jnp.float32) + b1p, 0.0)
        y = jnp.dot(h.astype(w2p.dtype), w2p,
                    preferred_element_type=jnp.float32) + b2p
        y = y if Hp == H else y[:, :H]
        return y.astype(out_dtype)

    tn = _choose_batch_tile(N, tile_n)
    grid = (pl.cdiv(N, tn),)

    x_itemsize = jnp.dtype(x.dtype).itemsize
    out_itemsize = out_dtype.itemsize
    w_itemsize = jnp.dtype(w1p.dtype).itemsize
    w_bytes = (F * Hp + Hp * Hp) * w_itemsize + 2 * Hp * 4

    # Resident (constant-block-index) weights: single-buffer them only when big
    # enough for double-buffering to matter for the VMEM budget (v7x: 64 MiB).
    resident_kwargs = {}
    if w_bytes > (8 << 20):
        resident_kwargs = dict(pipeline_mode=pl.Buffered(1))
    # TODO(synk): for H large enough that resident weights exceed VMEM (~H>2-3K
    # on v7x), add a second "arbitrary" grid axis tiling Hp with an f32
    # accumulator scratch instead of keeping the full weights resident.

    # Scoped-VMEM budget from the actual footprint, capped under physical VMEM.
    need = (2 * tn * F * x_itemsize            # double-buffered x tiles
            + 2 * tn * Hp * out_itemsize       # double-buffered output tiles
            + 2 * w_bytes                      # resident weights/biases
            + 2 * tn * Hp * 4)                 # f32 intermediates
    try:
        phys_vmem = pltpu.get_tpu_info().vmem_capacity_bytes
    except Exception:
        phys_vmem = 64 << 20                   # conservative (v7x per-core)
    vmem_limit = int(min(max(2 * need, 32 << 20), phys_vmem * 3 // 4))

    cost = pl.CostEstimate(
        flops=2 * N * F * Hp + 2 * N * Hp * Hp,
        transcendentals=0,
        bytes_accessed=N * F * x_itemsize + w_bytes + N * Hp * out_itemsize)

    out = pl.pallas_call(
        _mlp_kernel,
        out_shape=jax.ShapeDtypeStruct((N, Hp), out_dtype),
        grid_spec=pltpu.PrefetchScalarGridSpec(
            num_scalar_prefetch=0,
            grid=grid,
            in_specs=[
                # x tile streams (pipelined) over the batch axis; the trailing
                # partial tile is handled by Pallas boundary masking and rows
                # are independent, so no batch-padding copy is made.
                pl.BlockSpec((tn, F), lambda i: (i, 0)),
                # Weights/biases: constant block index -> DMA'd once, resident.
                pl.BlockSpec((F, Hp), lambda i: (0, 0), **resident_kwargs),
                pl.BlockSpec((1, Hp), lambda i: (0, 0), **resident_kwargs),
                pl.BlockSpec((Hp, Hp), lambda i: (0, 0), **resident_kwargs),
                pl.BlockSpec((1, Hp), lambda i: (0, 0), **resident_kwargs),
            ],
            out_specs=pl.BlockSpec((tn, Hp), lambda i: (i, 0)),
        ),
        compiler_params=pltpu.CompilerParams(
            dimension_semantics=("parallel",),   # independent batch tiles
            vmem_limit_bytes=vmem_limit,
        ),
        cost_estimate=cost,
    )(x, w1p, b1p, w2p, b2p)

    return out if Hp == H else out[:, :H]


def _init_params(key, feature_dim, hidden_dim, dtype=jnp.float32):
    """Mimics nn.Linear's uniform(-1/sqrt(fan_in), 1/sqrt(fan_in)) init.

    Weights are stored pre-transposed as (in_dim, out_dim)."""
    k1, k2, k3, k4 = jax.random.split(key, 4)
    bound1 = 1.0 / jnp.sqrt(feature_dim)
    bound2 = 1.0 / jnp.sqrt(hidden_dim)
    w1 = jax.random.uniform(k1, (feature_dim, hidden_dim), dtype, -bound1, bound1)
    b1 = jax.random.uniform(k2, (1, hidden_dim), dtype, -bound1, bound1)
    w2 = jax.random.uniform(k3, (hidden_dim, hidden_dim), dtype, -bound2, bound2)
    b2 = jax.random.uniform(k4, (1, hidden_dim), dtype, -bound2, bound2)
    return w1, b1, w2, b2


if __name__ == "__main__":
    batch, feature_dim, hidden_dim = 8, 16, 32

    key = jax.random.PRNGKey(0)
    kx, kp = jax.random.split(key)
    x = jax.random.normal(kx, (batch, feature_dim), jnp.float32)
    w1, b1, w2, b2 = _init_params(kp, feature_dim, hidden_dim)

    # Pad/cast the parameters once; reuse them for every forward call.
    params = prepare_params(w1, b1, w2, b2)

    # Force the Pallas path (fast path disabled) so the kernel is exercised.
    out = prototypical_network_forward(x, params, allow_xla_fast_path=False)
    out = jax.block_until_ready(out)
    assert out.shape == (batch, hidden_dim), out.shape

    # Reference matching the kernel's compute path (bf16 MXU operands, f32 acc).
    xb = x.astype(jnp.bfloat16)
    h_ref = jnp.dot(xb, w1.astype(jnp.bfloat16),
                    preferred_element_type=jnp.float32) + b1
    h_ref = jnp.maximum(h_ref, 0.0)
    ref_bf16 = jnp.dot(h_ref.astype(jnp.bfloat16), w2.astype(jnp.bfloat16),
                       preferred_element_type=jnp.float32) + b2
    assert jnp.allclose(out, ref_bf16, atol=2e-3, rtol=2e-3)

    # Full-precision PyTorch-equivalent reference (loose tol for bf16 operands).
    ref_f32 = jnp.maximum(x @ w1 + b1, 0.0) @ w2 + b2
    assert jnp.allclose(out, ref_f32, atol=5e-2, rtol=5e-2)

    print("KERNEL_OK")
</pallas_src>

<mosaic_0001>
module attributes {stable_mosaic.version = 11 : i64} {
  func.func @_mlp_kernel(%arg0: i32, %arg1: memref<8x16xf32, #tpu.memory_space<vmem>>, %arg2: memref<16x128xbf16, #tpu.memory_space<vmem>>, %arg3: memref<1x128xf32, #tpu.memory_space<vmem>>, %arg4: memref<128x128xbf16, #tpu.memory_space<vmem>>, %arg5: memref<1x128xf32, #tpu.memory_space<vmem>>, %arg6: memref<8x128xf32, #tpu.memory_space<vmem>>) attributes {dimension_semantics = [#tpu.dimension_semantics<parallel>], iteration_bounds = array<i64: 1>, scalar_prefetch = 0 : i64, scratch_operands = 0 : i64, tpu.core_type = #tpu.core_type<tc>, window_params = [{transform_indices = @transform_0, window_bounds = array<i64: 8, 16>}, {pipeline_mode = #tpu.pipeline_mode<synchronous>, transform_indices = @transform_1, window_bounds = array<i64: 16, 128>}, {pipeline_mode = #tpu.pipeline_mode<synchronous>, transform_indices = @transform_2, window_bounds = array<i64: 1, 128>}, {pipeline_mode = #tpu.pipeline_mode<synchronous>, transform_indices = @transform_3, window_bounds = array<i64: 128, 128>}, {pipeline_mode = #tpu.pipeline_mode<synchronous>, transform_indices = @transform_4, window_bounds = array<i64: 1, 128>}, {transform_indices = @transform_5, window_bounds = array<i64: 8, 128>}]} {
    %c0 = arith.constant 0 : index
    %c0_0 = arith.constant 0 : index
    %0 = vector.load %arg1[%c0, %c0_0] : memref<8x16xf32, #tpu.memory_space<vmem>>, vector<8x16xf32>
    %1 = arith.truncf %0 : vector<8x16xf32> to vector<8x16xbf16>
    %c0_1 = arith.constant 0 : index
    %c0_2 = arith.constant 0 : index
    %2 = vector.load %arg2[%c0_1, %c0_2] : memref<16x128xbf16, #tpu.memory_space<vmem>>, vector<16x128xbf16>
    %cst = arith.constant dense<0.000000e+00> : vector<8x128xf32>
    %3 = tpu.matmul %1, %2, %cst {dimension_numbers = #tpu.dot_dimension_numbers<[1], [0], [0], [1], [0, 0, 1, 1], [], []>} : vector<8x16xbf16>, vector<16x128xbf16>, vector<8x128xf32> -> vector<8x128xf32>
    %c0_3 = arith.constant 0 : index
    %c0_4 = arith.constant 0 : index
    %4 = vector.load %arg3[%c0_3, %c0_4] : memref<1x128xf32, #tpu.memory_space<vmem>>, vector<1x128xf32>
    %5 = vector.broadcast %4 : vector<1x128xf32> to vector<8x128xf32>
    %6 = arith.addf %3, %5 : vector<8x128xf32>
    %cst_5 = arith.constant 0.000000e+00 : f32
    %7 = vector.broadcast %cst_5 : f32 to vector<8x128xf32>
    %8 = arith.maximumf %6, %7 : vector<8x128xf32>
    %9 = arith.truncf %8 : vector<8x128xf32> to vector<8x128xbf16>
    %c0_6 = arith.constant 0 : index
    %c0_7 = arith.constant 0 : index
    %10 = vector.load %arg4[%c0_6, %c0_7] : memref<128x128xbf16, #tpu.memory_space<vmem>>, vector<128x128xbf16>
    %cst_8 = arith.constant dense<0.000000e+00> : vector<8x128xf32>
    %11 = tpu.matmul %9, %10, %cst_8 {dimension_numbers = #tpu.dot_dimension_numbers<[1], [0], [0], [1], [0, 0, 1, 1], [], []>} : vector<8x128xbf16>, vector<128x128xbf16>, vector<8x128xf32> -> vector<8x128xf32>
    %c0_9 = arith.constant 0 : index
    %c0_10 = arith.constant 0 : index
    %12 = vector.load %arg5[%c0_9, %c0_10] : memref<1x128xf32, #tpu.memory_space<vmem>>, vector<1x128xf32>
    %13 = vector.broadcast %12 : vector<1x128xf32> to vector<8x128xf32>
    %14 = arith.addf %11, %13 : vector<8x128xf32>
    %c0_11 = arith.constant 0 : index
    %c0_12 = arith.constant 0 : index
    %15 = vector.load %arg6[%c0_11, %c0_12] : memref<8x128xf32, #tpu.memory_space<vmem>>, vector<8x128xf32>
    tpu.vector_store %arg6[%c0_11, %c0_12], %14 {strides = array<i32>} : memref<8x128xf32, #tpu.memory_space<vmem>>, vector<8x128xf32>,
    return
  }
  func.func @transform_0(%arg0: i32) -> (i32, i32) {
    %c0_i32 = arith.constant 0 : i32
    %c0_i32_0 = arith.constant 0 : i32
    return %arg0, %c0_i32 : i32, i32
  }
  func.func @transform_1(%arg0: i32) -> (i32, i32) {
    %c0_i32 = arith.constant 0 : i32
    %c0_i32_0 = arith.constant 0 : i32
    %c0_i32_1 = arith.constant 0 : i32
    return %c0_i32, %c0_i32_0 : i32, i32
  }
  func.func @transform_2(%arg0: i32) -> (i32, i32) {
    %c0_i32 = arith.constant 0 : i32
    %c0_i32_0 = arith.constant 0 : i32
    %c0_i32_1 = arith.constant 0 : i32
    return %c0_i32, %c0_i32_0 : i32, i32
  }
  func.func @transform_3(%arg0: i32) -> (i32, i32) {
    %c0_i32 = arith.constant 0 : i32
    %c0_i32_0 = arith.constant 0 : i32
    %c0_i32_1 = arith.constant 0 : i32
    return %c0_i32, %c0_i32_0 : i32, i32
  }
  func.func @transform_4(%arg0: i32) -> (i32, i32) {
    %c0_i32 = arith.constant 0 : i32
    %c0_i32_0 = arith.constant 0 : i32
    %c0_i32_1 = arith.constant 0 : i32
    return %c0_i32, %c0_i32_0 : i32, i32
  }
  func.func @transform_5(%arg0: i32) -> (i32, i32) {
    %c0_i32 = arith.constant 0 : i32
    %c0_i32_0 = arith.constant 0 : i32
    return %arg0, %c0_i32 : i32, i32
  }
}

</mosaic_0001>

<bundles_post_ra>
// kernel: tpu_custom_call.1
= control target key start
LH: loop header
LB: loop body
LE: loop exit
PB: predicated region body
PF: predicated region fallthrough
CT: control target
= control target key end

     0   :  { %10 = vsyncpa [#allocation3], 0  ;;  %s510_s0 = inlined_call_operand.hbm [shape: f32[8,16], index: 0, kind: input, shape index: {}]   ;;  %s511_s1 = inlined_call_operand.hbm [shape: bf16[16,128], index: 1, kind: input, shape index: {}]   ;;  %s512_s2 = inlined_call_operand.vmem [shape: f32[1,128], index: 2, kind: input, shape index: {}]   ;;  %s513_s3 = inlined_call_operand.hbm [shape: bf16[128,128], index: 3, kind: input, shape index: {}]   ;;  %s514_s4 = inlined_call_operand.vmem [shape: f32[1,128], index: 4, kind: input, shape index: {}]   ;;  %s515_s5 = inlined_call_operand.hbm [shape: f32[8,128], index: 5, kind: output, shape index: {}]  }
   0x1   :  { %11 = vsyncpa [#allocation6], 0 }
   0x2   :  { %12 = vsyncpa [#allocation4], 0  ;;  %s412_s18 = smov [#allocation5]   ;;  %s318_s22 = scalar_lea.hbm %s511_s1, 128 }
   0x3   :  { %s28_s19 = sshll.u32 %s412_s18, 4  ;;  %p319_p0 = scmp.ne.s32.totalorder %s511_s1, %s318_s22  ;;  %s29_s19 = int_to_ptr.vmem [resolvable:$true] %s28_s19 }
   0x4   :  { %p322_p1 = scmp.lt.u32.totalorder %s318_s22, %s511_s1 }
   0x6   :  { %p324_p2 = pnand %p322_p1, %p319_p0 }
   0x8   :  { %327 = shalt.err (!%p324_p2)
}
   0x9   :  { %s328_s27 = scalar_lea.vmem %s29_s19, 128  ;;  %p333_p4 = scmp.lt.s32.totalorder %s29_s19, %s29_s19 }
   0xa   :  { %p329_p3 = scmp.ne.s32.totalorder %s29_s19, %s328_s27  ;;  %p334_p5 = scmp.lt.s32.totalorder %s328_s27, %s328_s27 }
   0xc   :  { %p335_p6 = por %p334_p5, %p333_p4 }
   0xe   :  { %p336_p7 = pnand %p335_p6, %p329_p3 }
  0x10   :  { %339 = shalt.err (!%p336_p7)
}
  0x11   :  { %s413_s28 = smov 64   ;;  %s414_s29 = smov 4  }
  0x12   :  { %34 = dma.hbm_to_vmem [thread:$0]  %s511_s1, 128, %s29_s19, [#allocation6], %s413_s28, %s413_s28, %s414_s29  }
  0x13   :  { %s415_s7 = smov [#allocation2]   ;;  %s416_s9 = smov [#allocation7]  }
  0x14   :  { %s19_s8 = sshll.u32 %s415_s7, 4  ;;  %s42_s10 = sshll.u32 %s416_s9, 4  ;;  %s20_s8 = int_to_ptr.vmem [resolvable:$true] %s19_s8  ;;  %s43_s10 = int_to_ptr.vmem [resolvable:$true] %s42_s10 }
  0x15   :  { %s340_s13 = scalar_lea.hbm %s510_s0, 128 }
  0x16   :  { %p341_p8 = scmp.ne.s32.totalorder %s510_s0, %s340_s13  ;;  %p344_p9 = scmp.lt.u32.totalorder %s340_s13, %s510_s0 }
  0x18   :  { %p346_p10 = pnand %p344_p9, %p341_p8 }
  0x1a   :  { %349 = shalt.err (!%p346_p10)
}
  0x1b   :  { %s350_s1 = scalar_lea.vmem %s20_s8, 128  ;;  %p355_p12 = scmp.lt.s32.totalorder %s20_s8, %s20_s8 }
  0x1c   :  { %p351_p11 = scmp.ne.s32.totalorder %s20_s8, %s350_s1  ;;  %p356_p13 = scmp.lt.s32.totalorder %s350_s1, %s350_s1 }
  0x1e   :  { %p357_p0 = por %p356_p13, %p355_p12 }
  0x20   :  { %p358_p1 = pnand %p357_p0, %p351_p11 }
  0x22   :  { %361 = shalt.err (!%p358_p1)
}
  0x23   :  { %22 = dma.hbm_to_vmem [thread:$0]  %s510_s0, 128, %s20_s8, [#allocation3]  }
  0x24   :  { %s362_s22 = scalar_lea.hbm %s513_s3, 1024 }
  0x25   :  { %p363_p2 = scmp.ne.s32.totalorder %s513_s3, %s362_s22  ;;  %p366_p3 = scmp.lt.u32.totalorder %s362_s22, %s513_s3 }
  0x27   :  { %p368_p4 = pnand %p366_p3, %p363_p2 }
  0x29   :  { %371 = shalt.err (!%p368_p4)
}
  0x2a   :  { %s372_s27 = scalar_lea.vmem %s43_s10, 1024  ;;  %p377_p6 = scmp.lt.s32.totalorder %s43_s10, %s43_s10 }
  0x2b   :  { %p373_p5 = scmp.ne.s32.totalorder %s43_s10, %s372_s27  ;;  %p378_p7 = scmp.lt.s32.totalorder %s372_s27, %s372_s27 }
  0x2d   :  { %p379_p8 = por %p378_p7, %p377_p6 }
  0x2f   :  { %p380_p9 = pnand %p379_p8, %p373_p5 }
  0x31   :  { %383 = shalt.err (!%p380_p9)
}
  0x32   :  { %48 = dma.hbm_to_vmem [thread:$0]  %s513_s3, 1024, %s43_s10, [#allocation6], %s413_s28, %s413_s28, %s414_s29  }
  0x33   :  { %406 = dma.done.wait [#allocation3], 128  }
  0x34   :  { %407 = vsyncadd [#allocation3], 4294967168 }
  0x35   :  { %408 = dma.done.wait [#allocation6], 1152  }
  0x36   :  { %409 = vsyncadd [#allocation6], 4294966144  ;;  %v417_v0 = vmov 0.0   ;;  %vm418_vm0 = vmmov 0   ;;  %v309_v1 = vld [vmem:[#allocation5] sm:$0xff]   ;;  %v61_v2 = vld [vmem:[#allocation2] sm:$0xff] }
  0x37   :  { %275 = vmatprep.subr.bf16.mxu0 %v417_v0  ;;  %277 = vmatprep.mubr.msk.bf16.mxu0 %vm418_vm0, %v417_v0  ;;  %v62_v3 = vpack.c.bf16 %v61_v2, %v61_v2  ;;  %vm78_vm1 = vcmask 130048   ;;  %v310_v4 = vld [vmem:[#allocation7] sm:$0xff]   ;;  %v311_v5 = vld [vmem:[#allocation7 + $0x8] sm:$0xff]   ;;  %v312_v6 = vld [vmem:[#allocation7 + $0x10] sm:$0xff]   ;;  %s419_s7 = smov [#allocation8]  }
  0x38   :  { %281 = vmatprep.subr.bf16.mxu1 %v417_v0  ;;  %297 = vmatprep.mubr.msk.bf16.mxu1 %vm418_vm0, %v417_v0  ;;  %v313_v7 = vld [vmem:[#allocation7 + $0x18] sm:$0xff]   ;;  %v314_v8 = vld [vmem:[#allocation7 + $0x20] sm:$0xff]   ;;  %v315_v9 = vld [vmem:[#allocation7 + $0x28] sm:$0xff]   ;;  %s242_s8 = sshll.u32 %s419_s7, 4  ;;  %s243_s8 = int_to_ptr.vmem [resolvable:$true] %s242_s8 }
  0x39   :  { %276 = vmatpush3.bf16.msra.mxu0 %v309_v1  ;;  %282 = vmatpush3.bf16.msra.mxu1 %v310_v4  ;;  %v316_v10 = vld [vmem:[#allocation7 + $0x30] sm:$0xff]   ;;  %v317_v11 = vld [vmem:[#allocation7 + $0x38] sm:$0xff]   ;;  %p389_p11 = scmp.lt.s32.totalorder %s243_s8, %s243_s8 }
  0x3a   :  { %283 = vmatprep.subr.bf16.mxu1 %v417_v0  ;;  %v252_v12 = vld [vmem:[%s512_s2] ss:$0 sm:$0xff]  ;;  %s384_s2 = scalar_lea.vmem %s243_s8, 128 }
  0x3b   :  { %v255_v20 = vld [vmem:[%s514_s4] ss:$0 sm:$0xff]  ;;  %p385_p10 = scmp.ne.s32.totalorder %s243_s8, %s384_s2  ;;  %p390_p12 = scmp.lt.s32.totalorder %s384_s2, %s384_s2 }
  0x3c   :  { %278 = vmatmul.mubr.msk.bf16.vlgmr.msra.gmra.mrb[0].mxu0 %vm78_vm1, %v62_v3 }
  0x3d   :  { %284 = vmatpush3.bf16.msra.mxu1 %v311_v5  ;;  %p391_p13 = por %p390_p12, %p389_p11 }
  0x3e   :  { %285 = vmatprep.subr.bf16.mxu1 %v417_v0 }
  0x3f   :  { %p392_p0 = pnand %p391_p13, %p385_p10 }
  0x41   :  { %286 = vmatpush3.bf16.msra.mxu1 %v312_v6 }
  0x42   :  { %287 = vmatprep.subr.bf16.mxu1 %v417_v0 }
  0x45   :  { %288 = vmatpush3.bf16.msra.mxu1 %v313_v7 }
  0x46   :  { %289 = vmatprep.subr.bf16.mxu1 %v417_v0 }
  0x49   :  { %290 = vmatpush3.bf16.msra.mxu1 %v314_v8 }
  0x4a   :  { %291 = vmatprep.subr.bf16.mxu1 %v417_v0 }
  0x4d   :  { %292 = vmatpush3.bf16.msra.mxu1 %v315_v9 }
  0x4e   :  { %293 = vmatprep.subr.bf16.mxu1 %v417_v0 }
  0x51   :  { %294 = vmatpush3.bf16.msra.mxu1 %v316_v10 }
  0x52   :  { %295 = vmatprep.subr.bf16.mxu1 %v417_v0 }
  0x55   :  { %296 = vmatpush3.bf16.msra.mxu1 %v317_v11 }
 0x10f   :  { %v116_v13 = vpop.f32.mrb[0].mxu0 }
 0x110   :  { %v117_v14 = vadd.f32 %v252_v12, %v116_v13  ;;  %v279_v15 = vpop.f32.mrb[1].mxu0 }
 0x111   :  { %v119_v16 = vpop.f32.mrb[2].mxu0 }
 0x112   :  { %v122_v17 = vmax.f32 %v117_v14, 0.0  ;;  %v280_v18 = vpop.f32.mrb[3].mxu0 }
 0x114   :  { %v123_v19 = vpack.c.bf16 %v122_v17, %v122_v17 }
 0x116   :  { %298 = vmatmul.mubr.bf16.vlgmr.msra.gmra.mrb[0].mxu1 %v123_v19 }
 0x1e9   :  { %v229_v21 = vpop.f32.mrb[0].mxu1 }
 0x1ea   :  { %v230_v22 = vadd.f32 %v255_v20, %v229_v21  ;;  %v299_v23 = vpop.f32.mrb[1].mxu1 }
 0x1eb   :  { %v232_v24 = vpop.f32.mrb[2].mxu1 }
 0x1ec   :  { %235 = vst [vmem:[#allocation8] sm:$0xff] %v230_v22  ;;  %v300_v25 = vpop.f32.mrb[3].mxu1 }
 0x1ed   :  { %395 = shalt.err (!%p392_p0)
}
 0x1ee   :  { %s396_s4 = scalar_lea.hbm %s515_s5, 128 }
 0x1ef   :  { %p397_p1 = scmp.ne.s32.totalorder %s515_s5, %s396_s4  ;;  %p400_p2 = scmp.lt.u32.totalorder %s396_s4, %s515_s5 }
 0x1f1   :  { %p402_p3 = pnand %p400_p2, %p397_p1 }
 0x1f3   :  { %405 = shalt.err (!%p402_p3)
}
 0x1f4   :  { %245 = dma.vmem_to_hbm [thread:$0]  %s243_s8, 128, %s515_s5, [#allocation4]  }
 0x1f5   :  { %410 = dma.done.wait [#allocation4], 128  }
 0x1f6   :  { %411 = vsyncadd [#allocation4], 4294967168 }
 0x1f7   :  { %249 = vsyncpa [#allocation3], 1 }
 0x1f8   :  { %250 = vsyncpa [#allocation6], 1 }
 0x1f9   :  { %251 = vsyncpa [#allocation4], 1 }

</bundles_post_ra>
